<compile_context>
chip_gen: v7x
topology: tpu7x:2x2x1
jax: 0.10.0
libtpu: 0.0.40
codegen_flags: <defaults>
</compile_context>

<pallas_src>
import numpy as np
import jax
import jax.numpy as jnp
from jax.experimental import pallas as pl
from jax.experimental.pallas import tpu as pltpu

LD_PAD = 128  # lane-dense width for the logdet output slab


def _round_up(x, m):
    return ((x + m - 1) // m) * m


def aflayer_kernel(yc_ref, y_ref, logdet_ref,
                   w1_ref, b1_ref,
                   w2_ref, b2_ref,
                   wa_ref, ba_ref,
                   wl_ref, bl_ref,
                   x_ref, ld_ref):
    # ---- MADE forward (autoregressive masks folded into the weights) ----
    # Fused first layer: single dot over the concatenated [y | cond] input.
    yc = yc_ref[...]                                                  # [TB, D+C] (bf16)
    h = jnp.tanh(
        jnp.dot(yc, w1_ref[...], preferred_element_type=jnp.float32) + b1_ref[...])
    h = jnp.tanh(
        jnp.dot(h.astype(w2_ref.dtype), w2_ref[...],
                preferred_element_type=jnp.float32) + b2_ref[...])
    hm = h.astype(wa_ref.dtype)

    # Separate lane-aligned output heads (avoid slicing a [*, 2D] result in-vreg).
    a = jnp.dot(hm, wa_ref[...], preferred_element_type=jnp.float32) + ba_ref[...]
    logb2 = jnp.dot(hm, wl_ref[...], preferred_element_type=jnp.float32) + bl_ref[...]

    # ---- Affine.reverse (train_func when swap_trngen_dirs=False) ----
    y = y_ref[...]                                                    # [TB, D] f32
    x_ref[...] = ((y - a) * jnp.exp(-0.5 * logb2)).astype(x_ref.dtype)

    change_logdet = -0.5 * jnp.sum(logb2, axis=-1, keepdims=True)     # [TB, 1]
    new_ld = logdet_ref[...] + change_logdet                          # [TB, 1]
    # Lane-dense, unmasked store; wrapper reads column 0.
    ld_ref[...] = jnp.broadcast_to(new_ld, ld_ref.shape)


def make_aflayer_params(key, data_dim, n_hidden_units, cond_dim, num_params=2,
                        matmul_dtype=jnp.bfloat16):
    """Deterministic MADE init; autoregressive masks folded in; matmul weights in bf16."""
    D, H, C = data_dim, n_hidden_units, cond_dim
    ks = jax.random.split(key, 7)
    s = 0.1
    W1 = jax.random.normal(ks[0], (D, H), jnp.float32) * s
    V1 = jax.random.normal(ks[1], (C, H), jnp.float32) * s      # conditional input: unmasked
    b1 = jax.random.normal(ks[2], (1, H), jnp.float32) * s
    W2 = jax.random.normal(ks[3], (H, H), jnp.float32) * s
    b2 = jax.random.normal(ks[4], (1, H), jnp.float32) * s
    Wout = jax.random.normal(ks[5], (H, D * num_params), jnp.float32) * s
    bout = jax.random.normal(ks[6], (1, D * num_params), jnp.float32) * s

    # MADE degrees: sequential input order (1..D), sequential hidden order.
    m_in = np.arange(1, D + 1)
    m_h = (np.arange(H) % max(D - 1, 1)) + 1
    M1 = (m_h[None, :] >= m_in[:, None]).astype(np.float32)     # [D, H]
    M2 = (m_h[None, :] >= m_h[:, None]).astype(np.float32)      # [H, H]
    Mo = (m_in[None, :] > m_h[:, None]).astype(np.float32)      # [H, D] strict inequality

    # Fuse first-layer weights: [(D+C), H] acting on the concatenated [y | cond] input.
    W1c = jnp.concatenate([W1 * jnp.asarray(M1), V1], axis=0)
    # Split output head: shift `a` and log-variance `logb2` blocks (same mask).
    Wa = Wout[:, :D] * jnp.asarray(Mo)
    Wl = Wout[:, D:] * jnp.asarray(Mo)

    return dict(
        W1c=W1c.astype(matmul_dtype), b1=b1,
        W2=(W2 * jnp.asarray(M2)).astype(matmul_dtype), b2=b2,
        Wa=Wa.astype(matmul_dtype), ba=bout[:, :D],
        Wl=Wl.astype(matmul_dtype), bl=bout[:, D:],
        output_order=jnp.asarray(m_in - 1),  # end_order analogue (0..D-1)
    )


def _vmem_limit_bytes(tb, D, C, H, mm_itemsize):
    f32 = 4
    act_in = 2 * tb * ((D + C) * mm_itemsize + (D + 1) * f32)         # double-buffered inputs
    outs = 2 * tb * (D + LD_PAD) * f32                                # double-buffered outputs
    wts = 2 * (((D + C) * H + H * H + 2 * H * D) * mm_itemsize
               + (2 * H + 2 * D) * f32)                               # weights (+ headroom)
    inter = tb * (2 * H + 2 * D + LD_PAD) * f32                       # live intermediates
    need = act_in + outs + wts + inter
    return int(min(max(2 * need + (4 << 20), 16 << 20), 64 << 20))    # cap at v7x physical


def aflayer_forward(inputs, params, *, tb=128, interpret=False):
    """inputs = (y [B,D], logdet [B], cond_inp [B,C]) -> (x, logdet+change, cond_inp)."""
    y, logdet, cond_inp = inputs
    B, D = y.shape
    C = cond_inp.shape[-1]
    H = params["W2"].shape[-1]
    mm_dtype = params["W1c"].dtype

    # Batch tile: multiple of 8 (sublane), no bigger than the (padded) batch.
    tb = max(8, min(_round_up(tb, 8), _round_up(B, 8)))
    B_pad = _round_up(B, tb)
    nb = B_pad // tb

    # Host-side glue: fused [y | cond] matmul input (matmul dtype), batch padding,
    # logdet as a column.
    yc = jnp.concatenate([y, cond_inp], axis=-1).astype(mm_dtype)
    y32 = y.astype(jnp.float32)
    ld = logdet.reshape(B, 1).astype(jnp.float32)
    if B_pad != B:
        pad = ((0, B_pad - B), (0, 0))
        yc = jnp.pad(yc, pad)
        y32 = jnp.pad(y32, pad)
        ld = jnp.pad(ld, pad)

    batch_spec = lambda shp: pl.BlockSpec(shp, lambda i: (i, 0))   # tiled over batch
    weight_spec = lambda shp: pl.BlockSpec(shp, lambda i: (0, 0))  # VMEM-resident

    x_pad, ld_pad = pl.pallas_call(
        aflayer_kernel,
        out_shape=(jax.ShapeDtypeStruct((B_pad, D), jnp.float32),
                   jax.ShapeDtypeStruct((B_pad, LD_PAD), jnp.float32)),
        grid=(nb,),
        in_specs=[batch_spec((tb, D + C)),
                  batch_spec((tb, D)),
                  batch_spec((tb, 1)),
                  weight_spec((D + C, H)), weight_spec((1, H)),
                  weight_spec((H, H)), weight_spec((1, H)),
                  weight_spec((H, D)), weight_spec((1, D)),
                  weight_spec((H, D)), weight_spec((1, D))],
        out_specs=(batch_spec((tb, D)),
                   batch_spec((tb, LD_PAD))),
        compiler_params=pltpu.CompilerParams(
            dimension_semantics=("parallel",),
            vmem_limit_bytes=_vmem_limit_bytes(tb, D, C, H,
                                               jnp.dtype(mm_dtype).itemsize)),
        interpret=interpret,
    )(yc, y32, ld,
      params["W1c"], params["b1"],
      params["W2"], params["b2"],
      params["Wa"], params["ba"],
      params["Wl"], params["bl"])

    x = x_pad[:B]
    new_logdet = ld_pad[:B, 0]
    return x, new_logdet, cond_inp


def aflayer_reference(inputs, p):
    """Pure-JAX reference with the same mixed-precision (bf16 matmul / f32 accum) semantics."""
    y, logdet, cond = inputs
    mm = p["W1c"].dtype
    yc = jnp.concatenate([y, cond], axis=-1).astype(mm)
    h = jnp.tanh(jnp.dot(yc, p["W1c"], preferred_element_type=jnp.float32) + p["b1"])
    h = jnp.tanh(jnp.dot(h.astype(mm), p["W2"], preferred_element_type=jnp.float32) + p["b2"])
    hm = h.astype(mm)
    a = jnp.dot(hm, p["Wa"], preferred_element_type=jnp.float32) + p["ba"]
    logb2 = jnp.dot(hm, p["Wl"], preferred_element_type=jnp.float32) + p["bl"]
    x = (y - a) * jnp.exp(-0.5 * logb2)
    return x, logdet - 0.5 * jnp.sum(logb2, axis=-1), cond


# TODO(synk): `generate()` (the sequential per-dimension inverse loop) is not part of
# forward() and is not implemented here.

if __name__ == "__main__":
    # batch, data_dim, n_hidden_units, conditional_inp_dim
    B, D, H, C = 256, 8, 64, 16
    key = jax.random.PRNGKey(0)
    kp, ky, kc, kl = jax.random.split(key, 4)

    params = make_aflayer_params(kp, data_dim=D, n_hidden_units=H, cond_dim=C)

    y = jax.random.normal(ky, (B, D), jnp.float32)
    cond_inp = jax.random.normal(kc, (B, C), jnp.float32)
    logdet = jax.random.normal(kl, (B,), jnp.float32)

    x, new_logdet, cond_out = aflayer_forward((y, logdet, cond_inp), params, tb=128)
    jax.block_until_ready((x, new_logdet, cond_out))

    x_ref, ld_ref, _ = aflayer_reference((y, logdet, cond_inp), params)
    assert jnp.allclose(x, x_ref, atol=1e-4, rtol=1e-4), \
        float(jnp.max(jnp.abs(x - x_ref)))
    assert jnp.allclose(new_logdet, ld_ref, atol=1e-4, rtol=1e-4), \
        float(jnp.max(jnp.abs(new_logdet - ld_ref)))
    assert jnp.allclose(cond_out, cond_inp)

    print("KERNEL_OK")
</pallas_src>

<mosaic_0001>
module attributes {stable_mosaic.version = 11 : i64} {
  func.func @aflayer_kernel(%arg0: i32, %arg1: memref<128x24xbf16, #tpu.memory_space<vmem>>, %arg2: memref<128x8xf32, #tpu.memory_space<vmem>>, %arg3: memref<128x1xf32, #tpu.memory_space<vmem>>, %arg4: memref<24x64xbf16, #tpu.memory_space<vmem>>, %arg5: memref<1x64xf32, #tpu.memory_space<vmem>>, %arg6: memref<64x64xbf16, #tpu.memory_space<vmem>>, %arg7: memref<1x64xf32, #tpu.memory_space<vmem>>, %arg8: memref<64x8xbf16, #tpu.memory_space<vmem>>, %arg9: memref<1x8xf32, #tpu.memory_space<vmem>>, %arg10: memref<64x8xbf16, #tpu.memory_space<vmem>>, %arg11: memref<1x8xf32, #tpu.memory_space<vmem>>, %arg12: memref<128x8xf32, #tpu.memory_space<vmem>>, %arg13: memref<128x128xf32, #tpu.memory_space<vmem>>) attributes {dimension_semantics = [#tpu.dimension_semantics<parallel>], iteration_bounds = array<i64: 2>, scalar_prefetch = 0 : i64, scratch_operands = 0 : i64, tpu.core_type = #tpu.core_type<tc>, window_params = [{transform_indices = @transform_0, window_bounds = array<i64: 128, 24>}, {transform_indices = @transform_1, window_bounds = array<i64: 128, 8>}, {transform_indices = @transform_2, window_bounds = array<i64: 128, 1>}, {pipeline_mode = #tpu.pipeline_mode<synchronous>, transform_indices = @transform_3, window_bounds = array<i64: 24, 64>}, {pipeline_mode = #tpu.pipeline_mode<synchronous>, transform_indices = @transform_4, window_bounds = array<i64: 1, 64>}, {pipeline_mode = #tpu.pipeline_mode<synchronous>, transform_indices = @transform_5, window_bounds = array<i64: 64, 64>}, {pipeline_mode = #tpu.pipeline_mode<synchronous>, transform_indices = @transform_6, window_bounds = array<i64: 1, 64>}, {pipeline_mode = #tpu.pipeline_mode<synchronous>, transform_indices = @transform_7, window_bounds = array<i64: 64, 8>}, {pipeline_mode = #tpu.pipeline_mode<synchronous>, transform_indices = @transform_8, window_bounds = array<i64: 1, 8>}, {pipeline_mode = #tpu.pipeline_mode<synchronous>, transform_indices = @transform_9, window_bounds = array<i64: 64, 8>}, {pipeline_mode = #tpu.pipeline_mode<synchronous>, transform_indices = @transform_10, window_bounds = array<i64: 1, 8>}, {transform_indices = @transform_11, window_bounds = array<i64: 128, 8>}, {transform_indices = @transform_12, window_bounds = array<i64: 128, 128>}]} {
    %c0 = arith.constant 0 : index
    %c0_0 = arith.constant 0 : index
    %0 = vector.load %arg1[%c0, %c0_0] : memref<128x24xbf16, #tpu.memory_space<vmem>>, vector<128x24xbf16>
    %c0_1 = arith.constant 0 : index
    %c0_2 = arith.constant 0 : index
    %1 = vector.load %arg4[%c0_1, %c0_2] : memref<24x64xbf16, #tpu.memory_space<vmem>>, vector<24x64xbf16>
    %cst = arith.constant dense<0.000000e+00> : vector<128x64xf32>
    %2 = tpu.matmul %0, %1, %cst {dimension_numbers = #tpu.dot_dimension_numbers<[1], [0], [0], [1], [0, 0, 1, 1], [], []>} : vector<128x24xbf16>, vector<24x64xbf16>, vector<128x64xf32> -> vector<128x64xf32>
    %c0_3 = arith.constant 0 : index
    %c0_4 = arith.constant 0 : index
    %3 = vector.load %arg5[%c0_3, %c0_4] : memref<1x64xf32, #tpu.memory_space<vmem>>, vector<1x64xf32>
    %4 = vector.broadcast %3 : vector<1x64xf32> to vector<128x64xf32>
    %5 = arith.addf %2, %4 : vector<128x64xf32>
    %6 = math.tanh %5 : vector<128x64xf32>
    %7 = arith.truncf %6 : vector<128x64xf32> to vector<128x64xbf16>
    %c0_5 = arith.constant 0 : index
    %c0_6 = arith.constant 0 : index
    %8 = vector.load %arg6[%c0_5, %c0_6] : memref<64x64xbf16, #tpu.memory_space<vmem>>, vector<64x64xbf16>
    %cst_7 = arith.constant dense<0.000000e+00> : vector<128x64xf32>
    %9 = tpu.matmul %7, %8, %cst_7 {dimension_numbers = #tpu.dot_dimension_numbers<[1], [0], [0], [1], [0, 0, 1, 1], [], []>} : vector<128x64xbf16>, vector<64x64xbf16>, vector<128x64xf32> -> vector<128x64xf32>
    %c0_8 = arith.constant 0 : index
    %c0_9 = arith.constant 0 : index
    %10 = vector.load %arg7[%c0_8, %c0_9] : memref<1x64xf32, #tpu.memory_space<vmem>>, vector<1x64xf32>
    %11 = vector.broadcast %10 : vector<1x64xf32> to vector<128x64xf32>
    %12 = arith.addf %9, %11 : vector<128x64xf32>
    %13 = math.tanh %12 : vector<128x64xf32>
    %14 = arith.truncf %13 : vector<128x64xf32> to vector<128x64xbf16>
    %c0_10 = arith.constant 0 : index
    %c0_11 = arith.constant 0 : index
    %15 = vector.load %arg8[%c0_10, %c0_11] : memref<64x8xbf16, #tpu.memory_space<vmem>>, vector<64x8xbf16>
    %cst_12 = arith.constant dense<0.000000e+00> : vector<128x8xf32>
    %16 = tpu.matmul %14, %15, %cst_12 {dimension_numbers = #tpu.dot_dimension_numbers<[1], [0], [0], [1], [0, 0, 1, 1], [], []>} : vector<128x64xbf16>, vector<64x8xbf16>, vector<128x8xf32> -> vector<128x8xf32>
    %c0_13 = arith.constant 0 : index
    %c0_14 = arith.constant 0 : index
    %17 = vector.load %arg9[%c0_13, %c0_14] : memref<1x8xf32, #tpu.memory_space<vmem>>, vector<1x8xf32>
    %18 = vector.broadcast %17 : vector<1x8xf32> to vector<128x8xf32>
    %19 = arith.addf %16, %18 : vector<128x8xf32>
    %c0_15 = arith.constant 0 : index
    %c0_16 = arith.constant 0 : index
    %20 = vector.load %arg10[%c0_15, %c0_16] : memref<64x8xbf16, #tpu.memory_space<vmem>>, vector<64x8xbf16>
    %cst_17 = arith.constant dense<0.000000e+00> : vector<128x8xf32>
    %21 = tpu.matmul %14, %20, %cst_17 {dimension_numbers = #tpu.dot_dimension_numbers<[1], [0], [0], [1], [0, 0, 1, 1], [], []>} : vector<128x64xbf16>, vector<64x8xbf16>, vector<128x8xf32> -> vector<128x8xf32>
    %c0_18 = arith.constant 0 : index
    %c0_19 = arith.constant 0 : index
    %22 = vector.load %arg11[%c0_18, %c0_19] : memref<1x8xf32, #tpu.memory_space<vmem>>, vector<1x8xf32>
    %23 = vector.broadcast %22 : vector<1x8xf32> to vector<128x8xf32>
    %24 = arith.addf %21, %23 : vector<128x8xf32>
    %c0_20 = arith.constant 0 : index
    %c0_21 = arith.constant 0 : index
    %25 = vector.load %arg2[%c0_20, %c0_21] : memref<128x8xf32, #tpu.memory_space<vmem>>, vector<128x8xf32>
    %26 = arith.subf %25, %19 : vector<128x8xf32>
    %cst_22 = arith.constant -5.000000e-01 : f32
    %27 = vector.broadcast %cst_22 : f32 to vector<128x8xf32>
    %28 = arith.mulf %27, %24 : vector<128x8xf32>
    %29 = math.exp %28 : vector<128x8xf32>
    %30 = arith.mulf %26, %29 : vector<128x8xf32>
    %c0_23 = arith.constant 0 : index
    %c0_24 = arith.constant 0 : index
    %31 = vector.load %arg12[%c0_23, %c0_24] : memref<128x8xf32, #tpu.memory_space<vmem>>, vector<128x8xf32>
    tpu.vector_store %arg12[%c0_23, %c0_24], %30 {strides = array<i32>} : memref<128x8xf32, #tpu.memory_space<vmem>>, vector<128x8xf32>,
    %cst_25 = arith.constant dense<0.000000e+00> : vector<128xf32>
    %32 = vector.multi_reduction <add>, %24, %cst_25 [1] : vector<128x8xf32> to vector<128xf32>
    %33 = vector.shape_cast %32 : vector<128xf32> to vector<128x1xf32>
    %cst_26 = arith.constant -5.000000e-01 : f32
    %34 = vector.broadcast %cst_26 : f32 to vector<128x1xf32>
    %35 = arith.mulf %34, %33 : vector<128x1xf32>
    %c0_27 = arith.constant 0 : index
    %c0_28 = arith.constant 0 : index
    %36 = vector.load %arg3[%c0_27, %c0_28] : memref<128x1xf32, #tpu.memory_space<vmem>>, vector<128x1xf32>
    %37 = arith.addf %36, %35 : vector<128x1xf32>
    %38 = vector.shape_cast %37 : vector<128x1xf32> to vector<128x1xf32>
    %39 = vector.broadcast %38 : vector<128x1xf32> to vector<128x128xf32>
    %c0_29 = arith.constant 0 : index
    %c0_30 = arith.constant 0 : index
    %40 = vector.load %arg13[%c0_29, %c0_30] : memref<128x128xf32, #tpu.memory_space<vmem>>, vector<128x128xf32>
    tpu.vector_store %arg13[%c0_29, %c0_30], %39 {strides = array<i32>} : memref<128x128xf32, #tpu.memory_space<vmem>>, vector<128x128xf32>,
    return
  }
  func.func @transform_0(%arg0: i32) -> (i32, i32) {
    %c0_i32 = arith.constant 0 : i32
    %c0_i32_0 = arith.constant 0 : i32
    return %arg0, %c0_i32 : i32, i32
  }
  func.func @transform_1(%arg0: i32) -> (i32, i32) {
    %c0_i32 = arith.constant 0 : i32
    %c0_i32_0 = arith.constant 0 : i32
    return %arg0, %c0_i32 : i32, i32
  }
  func.func @transform_2(%arg0: i32) -> (i32, i32) {
    %c0_i32 = arith.constant 0 : i32
    %c0_i32_0 = arith.constant 0 : i32
    return %arg0, %c0_i32 : i32, i32
  }
  func.func @transform_3(%arg0: i32) -> (i32, i32) {
    %c0_i32 = arith.constant 0 : i32
    %c0_i32_0 = arith.constant 0 : i32
    %c0_i32_1 = arith.constant 0 : i32
    return %c0_i32, %c0_i32_0 : i32, i32
  }
  func.func @transform_4(%arg0: i32) -> (i32, i32) {
    %c0_i32 = arith.constant 0 : i32
    %c0_i32_0 = arith.constant 0 : i32
    %c0_i32_1 = arith.constant 0 : i32
    return %c0_i32, %c0_i32_0 : i32, i32
  }
  func.func @transform_5(%arg0: i32) -> (i32, i32) {
    %c0_i32 = arith.constant 0 : i32
    %c0_i32_0 = arith.constant 0 : i32
    %c0_i32_1 = arith.constant 0 : i32
    return %c0_i32, %c0_i32_0 : i32, i32
  }
  func.func @transform_6(%arg0: i32) -> (i32, i32) {
    %c0_i32 = arith.constant 0 : i32
    %c0_i32_0 = arith.constant 0 : i32
    %c0_i32_1 = arith.constant 0 : i32
    return %c0_i32, %c0_i32_0 : i32, i32
  }
  func.func @transform_7(%arg0: i32) -> (i32, i32) {
    %c0_i32 = arith.constant 0 : i32
    %c0_i32_0 = arith.constant 0 : i32
    %c0_i32_1 = arith.constant 0 : i32
    return %c0_i32, %c0_i32_0 : i32, i32
  }
  func.func @transform_8(%arg0: i32) -> (i32, i32) {
    %c0_i32 = arith.constant 0 : i32
    %c0_i32_0 = arith.constant 0 : i32
    %c0_i32_1 = arith.constant 0 : i32
    return %c0_i32, %c0_i32_0 : i32, i32
  }
  func.func @transform_9(%arg0: i32) -> (i32, i32) {
    %c0_i32 = arith.constant 0 : i32
    %c0_i32_0 = arith.constant 0 : i32
    %c0_i32_1 = arith.constant 0 : i32
    return %c0_i32, %c0_i32_0 : i32, i32
  }
  func.func @transform_10(%arg0: i32) -> (i32, i32) {
    %c0_i32 = arith.constant 0 : i32
    %c0_i32_0 = arith.constant 0 : i32
    %c0_i32_1 = arith.constant 0 : i32
    return %c0_i32, %c0_i32_0 : i32, i32
  }
  func.func @transform_11(%arg0: i32) -> (i32, i32) {
    %c0_i32 = arith.constant 0 : i32
    %c0_i32_0 = arith.constant 0 : i32
    return %arg0, %c0_i32 : i32, i32
  }
  func.func @transform_12(%arg0: i32) -> (i32, i32) {
    %c0_i32 = arith.constant 0 : i32
    %c0_i32_0 = arith.constant 0 : i32
    return %arg0, %c0_i32 : i32, i32
  }
}

</mosaic_0001>

<bundles_post_ra>
// kernel: tpu_custom_call.1
= control target key start
LH: loop header
LB: loop body
LE: loop exit
PB: predicated region body
PF: predicated region fallthrough
CT: control target
= control target key end

     0   :  { %s2553_s0 = inlined_call_operand.vmem [shape: bf16[256,24], index: 0, kind: input, shape index: {}]   ;;  %s2554_s1 = inlined_call_operand.vmem [shape: f32[256,8], index: 1, kind: input, shape index: {}]   ;;  %s2555_s2 = inlined_call_operand.vmem [shape: f32[256,1], index: 2, kind: input, shape index: {}]   ;;  %s2556_s3 = inlined_call_operand.vmem [shape: bf16[24,64], index: 3, kind: input, shape index: {}]   ;;  %s2557_s4 = inlined_call_operand.vmem [shape: f32[1,64], index: 4, kind: input, shape index: {}]   ;;  %s2558_s5 = inlined_call_operand.vmem [shape: bf16[64,64], index: 5, kind: input, shape index: {}]   ;;  %s2559_s6 = inlined_call_operand.vmem [shape: f32[1,64], index: 6, kind: input, shape index: {}]   ;;  %s2560_s7 = inlined_call_operand.vmem [shape: bf16[64,8], index: 7, kind: input, shape index: {}]   ;;  %s2561_s8 = inlined_call_operand.vmem [shape: f32[1,8], index: 8, kind: input, shape index: {}]   ;;  %s2562_s9 = inlined_call_operand.vmem [shape: bf16[64,8], index: 9, kind: input, shape index: {}]   ;;  %s2563_s10 = inlined_call_operand.vmem [shape: f32[1,8], index: 10, kind: input, shape index: {}]   ;;  %s2564_s11 = inlined_call_operand.vmem [shape: f32[256,8], index: 11, kind: output, shape index: {0}]   ;;  %s2565_s12 = inlined_call_operand.hbm [shape: f32[256,128], index: 12, kind: output, shape index: {1}]  }
   0x1   :  { %2566 = sst [smem:[#allocation5_spill]] %s2553_s0 }
   0x2   :  { %18 = vsyncpa [#allocation3], 0 }
   0x3   :  { %20 = vsyncpa [#allocation3 + $0x1], 0  ;;  %s2130_s21 = smov 0   ;;  %s2132_s22 = smov 0  }
   0x4   :  { %s2134_s23 = smov 0   ;;  %s2136_s24 = smov 0  }
   0x5 LB: > { %s2151_s25 = sadd.s32 4294967295, %s2059_s24   ;;  %s1619_s26 = sadd.s32 4294967294, %s2059_s24   ;;  %s2059_s24 = sphi %s2136_s24, %s2573_s24   ;;  %s2055_s23 = sphi %s2134_s23, %s2572_s23   ;;  %s2051_s22 = sphi %s2132_s22, %s2571_s22   ;;  %s2047_s21 = sphi %s2130_s21, %s2570_s21  }
   0x6   : > { %s2155_s27 = sadd.s32 1, %s2059_s24   ;;  %s305_s28 = sadd.s32 1, %s2055_s23 }
   0x7   : > { %s302_s29 = ssub.s32 %s2059_s24, %s2155_s27  ;;  %p315_p0 = scmp.ne.s32.totalorder %s2055_s23, %s2051_s22 }
   0x8   : > { %p303_p1 = scmp.eq.s32.totalorder %s302_s29, 0  ;;  %p316_p2 = scmp.eq.s32.totalorder %s2151_s25, 1 }
   0x9   : > { %p321_p3 = scmp.ne.s32.totalorder %s2051_s22, %s2047_s21  ;;  %p322_p4 = scmp.eq.s32.totalorder %s1619_s26, 1 }
   0xa   : > { %s2166_s30 = scalar_select %p303_p1, %s2055_s23, %s305_s28  }
   0xb   : > { %p2168_p5 = por %p316_p2, %p315_p0  ;;  %p2172_p6 = por %p322_p4, %p321_p3 }
   0xc   : > { %p1622_p7 = scmp.ge.s32.totalorder %s2059_s24, 1  ;;  %p391_p8 = scmp.lt.s32.totalorder %s2059_s24, 3 }
   0xe   : > { %p392_p9 = pnand %p1622_p7, %p391_p8 }
   0xf   : > { %v1879_v0 = vld [vmem:[%s2556_s3] sm:$0xff] (!%p392_p9)   ;;  %v1880_v1 = vld [vmem:[%s2556_s3 + $0x8] ss:$0 sps:$4 sm:$0xff] (!%p392_p9)   ;;  %vm574_vm0 = vcmask (!%p392_p9), 1043456   ;;  %s1624_s19 = sshll.u32 (!%p392_p9), %s2151_s25, 4  ;;  %vm549_vm1 = vcmask (!%p392_p9), 195584  }
  0x10   : > { %395 = sbr.rel (%p392_p9) target bundleno = 1034 (0x40a), region = 64  ;;  %1742 = vmatprep.subr.bf16.mxu0 (!%p392_p9), %v1879_v0  ;;  %p449_p10 = scmp.lt.s32.totalorder (!%p392_p9), %s1624_s19, 31  ;;  %v576_v2 = vsel (!%p392_p9), %vm574_vm0, %v1880_v1, 0  ;;  %v1889_v11 = vld [vmem:[%s2558_s5] sm:$0xff] (!%p392_p9)   ;;  %v1890_v12 = vld [vmem:[%s2558_s5 + $0x8] sm:$0xff] (!%p392_p9)   ;;  %v1891_v13 = vld [vmem:[%s2558_s5 + $0x10] sm:$0xff] (!%p392_p9)  }
  0x11   : > { %1743 = vmatpush3.bf16.msra.mxu0 (!%p392_p9), %v1879_v0  ;;  %s2569_s0 = sld [smem:[#allocation5_spill]] (!%p392_p9)  ;;  %1762 = vmatprep.subr.bf16.mxu1 (!%p392_p9), %v1889_v11  ;;  %v1892_v14 = vld [vmem:[%s2558_s5 + $0x18] sm:$0xff] (!%p392_p9)   ;;  %v1893_v15 = vld [vmem:[%s2562_s9] sm:$0xff] (!%p392_p9)   ;;  %vm738_vm2 = vcmask (!%p392_p9), 523264   ;;  %v1894_v44 = vld [vmem:[%s2562_s9 + $0x8] sm:$0xff] (!%p392_p9)   ;;  %vm1276_vm3 = vcmask (!%p392_p9), 64512  }
  0x12   : > { %1834 = vmatprep.subr.msk.bf16.mxu0 (!%p392_p9), %vm574_vm0, %v1880_v1  ;;  %1763 = vmatpush3.bf16.msra.mxu1 (!%p392_p9), %v1889_v11  ;;  %v2217_v16 = vld [vmem:[%s2557_s4] ss:$0 sm:$0xff] (!%p392_p9)  ;;  %v1897_v11 = vld [vmem:[%s2560_s7 + $0x8] sm:$0xff] (!%p392_p9)   ;;  %s1695_s18 = sshll.u32 (!%p392_p9), %s2151_s25, 11  ;;  %s2062_s25 = smov (!%p392_p9), [#allocation2]  }
  0x13   : > { %1764 = vmatprep.subr.bf16.mxu1 (!%p392_p9), %v1890_v12  ;;  %s2505_s15 = scalar_lea.hbm (!%p392_p9), %s2565_s12, %s1695_s18 }
  0x15   : > { %1745 = vmatpush3.bf16.msra.mxu0 (!%p392_p9), %v576_v2 }
  0x16   : > { %1765 = vmatpush3.bf16.msra.mxu1 (!%p392_p9), %v1890_v12  ;;  %v1895_v12 = vld [vmem:[%s2562_s9 + $0x10] sm:$0xff] (!%p392_p9)  }
  0x17   : > { %s2575_s19 = smov (!%p449_p10, %s1624_s19), 31  ;;  %1766 = vmatprep.subr.bf16.mxu1 %v1891_v13 }
  0x18   : > { %s1625_s20 = sshll.u32 %s2575_s19, 2  ;;  %s2312_s28 = sshll.u32 %s2575_s19, 3 }
  0x19   : > { %s452_s29 = scalar_lea.vmem %s2569_s0, %s1625_s20  ;;  %s2326_s17 = scalar_lea.vmem %s2554_s1, %s2312_s28 }
  0x1a   : > { %v1881_v3 = vld [vmem:[%s452_s29] sm:$0xff]   ;;  %v1882_v4 = vld [vmem:[%s452_s29 + $0x8] sm:$0xff]   ;;  %v1883_v5 = vld [vmem:[%s452_s29 + $0x10] sm:$0xff]   ;;  %1767 = vmatpush3.bf16.msra.mxu1 %v1891_v13  ;;  %s2356_s26 = scalar_lea.vmem %s2564_s11, %s2312_s28  ;;  %s2462_s19 = scalar_lea.vmem %s2555_s2, %s2312_s28 }
  0x1b   : > { %1746 = vmatprep.mubr.msk.bf16.mxu0 %vm549_vm1, %v1881_v3  ;;  %v1884_v6 = vld [vmem:[%s452_s29 + $0x18] sm:$0xff]   ;;  %v1885_v7 = vld [vmem:[%s452_s29 + $0x20] sm:$0xff]   ;;  %v1886_v8 = vld [vmem:[%s452_s29 + $0x28] sm:$0xff]   ;;  %1768 = vmatprep.subr.bf16.mxu1 %v1892_v14  ;;  %s445_s28 = sand.u32 1, %s2051_s22   ;;  %s2001_s0 = sshll.u32 %s2062_s25, 4  ;;  %s2002_s0 = int_to_ptr.vmem [resolvable:$false] %s2001_s0 }
  0x1c   : > { %1747 = vmatmul.mubr.msk.bf16.vlgmr.msra.gmra.mrb[0].mxu0 %vm549_vm1, %v1882_v4  ;;  %v1887_v9 = vld [vmem:[%s452_s29 + $0x30] sm:$0xff]   ;;  %v1888_v10 = vld [vmem:[%s452_s29 + $0x38] sm:$0xff]   ;;  %s1623_s16 = sshll.u32 %s445_s28, 7  ;;  %s2003_s18 = scalar_lea.vmem %s2002_s0, 4096 }
  0x1d   : > { %1750 = vmatprep.mubr.msk.bf16.mxu0 %vm549_vm1, %v1883_v5  ;;  %v1899_v13 = vld [vmem:[%s2560_s7 + $0x10] sm:$0xff]  }
  0x1e   : > { %1769 = vmatpush3.bf16.msra.mxu1 %v1892_v14  ;;  %v1898_v14 = vld [vmem:[%s2562_s9 + $0x18] sm:$0xff]  }
  0x1f   : > { %1810 = vmatprep.subr.bf16.mxu1 %v1893_v15 }
  0x24   : > { %1751 = vmatmul.mubr.msk.bf16.gmra.mrb[4].mxu0 %vm549_vm1, %v1884_v6 }
  0x25   : > { %1754 = vmatprep.mubr.msk.bf16.mxu0 %vm549_vm1, %v1885_v7 }
  0x2c   : > { %1755 = vmatmul.mubr.msk.bf16.gmra.mrb[8].mxu0 %vm549_vm1, %v1886_v8 }
  0x2d   : > { %1758 = vmatprep.mubr.msk.bf16.mxu0 %vm549_vm1, %v1887_v9 }
  0x34   : > { %1759 = vmatmul.mubr.msk.bf16.gmra.mrb[12].mxu0 %vm549_vm1, %v1888_v10  ;;  %v1896_v10 = vld [vmem:[%s2560_s7] sm:$0xff]  }
  0x35   : > { %1786 = vmatprep.subr.bf16.mxu0 %v1896_v10 }
  0x36   : > { %1787 = vmatpush3.bf16.msra.mxu0 %v1896_v10 }
  0x37   : > { %1788 = vmatprep.subr.bf16.mxu0 %v1897_v11 }
  0x3a   : > { %1789 = vmatpush3.bf16.msra.mxu0 %v1897_v11 }
  0x3b   : > { %1790 = vmatprep.subr.bf16.mxu0 %v1899_v13 }
  0x3e   : > { %1791 = vmatpush3.bf16.msra.mxu0 %v1899_v13 }
  0xef   : > { %v1748_v17 = vpop.f32.mrb[0].mxu0 }
  0xf0   : > { %v621_v18 = vadd.f32 %v1748_v17, %v2217_v16  ;;  %v612_v19 = vpop.f32.mrb[1].mxu0 }
  0xf1   : > { %v613_v20 = vadd.f32 %v2217_v16, %v612_v19  ;;  %v1749_v21 = vpop.f32.mrb[2].mxu0 }
  0xf2   : > { %1901 = vtanh.f32 %v621_v18  ;;  %v624_v22 = vadd.f32 %v1749_v21, %v2217_v16  ;;  %v615_v23 = vpop.f32.mrb[3].mxu0 }
  0xf3   : > { %1903 = vtanh.f32 %v613_v20  ;;  %v616_v24 = vadd.f32 %v2217_v16, %v615_v23 }
  0xf4   : > { %1905 = vtanh.f32 %v624_v22 }
  0xf5   : > { %1907 = vtanh.f32 %v616_v24 }
  0xf7   : > { %v1752_v25 = vpop.f32.mrb[4].mxu0 }
  0xf8   : > { %v637_v26 = vadd.f32 %v1752_v25, %v2217_v16  ;;  %v628_v27 = vpop.f32.mrb[5].mxu0 }
  0xf9   : > { %v629_v28 = vadd.f32 %v2217_v16, %v628_v27  ;;  %v1753_v29 = vpop.f32.mrb[6].mxu0 }
  0xfa   : > { %1909 = vtanh.f32 %v637_v26  ;;  %v640_v30 = vadd.f32 %v1753_v29, %v2217_v16  ;;  %v631_v31 = vpop.f32.mrb[7].mxu0 }
  0xfb   : > { %1911 = vtanh.f32 %v629_v28  ;;  %v632_v32 = vadd.f32 %v2217_v16, %v631_v31 }
  0xfc   : > { %v1902_v33 = vpop.eup %1901  ;;  %1913 = vtanh.f32 %v640_v30 }
  0xfd   : > { %v1904_v34 = vpop.eup %1903  ;;  %1915 = vtanh.f32 %v632_v32 }
  0xfe   : > { %v1906_v35 = vpop.eup %1905 }
  0xff   : > { %v1908_v36 = vpop.eup %1907  ;;  %v1756_v37 = vpop.f32.mrb[8].mxu0  ;;  %v692_v38 = vpack.c.bf16 %v1906_v35, %v1902_v33 }
 0x100   : > { %v653_v39 = vadd.f32 %v1756_v37, %v2217_v16  ;;  %v644_v40 = vpop.f32.mrb[9].mxu0  ;;  %v691_v41 = vpack.c.bf16 %v1908_v36, %v1904_v34 }
 0x101   : > { %v645_v42 = vadd.f32 %v2217_v16, %v644_v40  ;;  %v1757_v43 = vpop.f32.mrb[10].mxu0 }
 0x102   : > { %1917 = vtanh.f32 %v653_v39  ;;  %v656_v45 = vadd.f32 %v1757_v43, %v2217_v16  ;;  %v647_v46 = vpop.f32.mrb[11].mxu0  ;;  %1770 = vmatprep.mubr.msk.bf16.mxu1 %vm738_vm2, %v691_v41 }
 0x103   : > { %1919 = vtanh.f32 %v645_v42  ;;  %v648_v47 = vadd.f32 %v2217_v16, %v647_v46  ;;  %1771 = vmatmul.mubr.msk.bf16.vlgmr.msra.gmra.mrb[0].mxu1 %vm738_vm2, %v692_v38 }
 0x104   : > { %v1910_v48 = vpop.eup %1909  ;;  %1921 = vtanh.f32 %v656_v45  ;;  %1811 = vmatpush3.bf16.msra.mxu1 %v1893_v15  ;;  %v1900_v15 = vld [vmem:[%s2560_s7 + $0x18] sm:$0xff]  }
 0x105   : > { %v1912_v49 = vpop.eup %1911  ;;  %1923 = vtanh.f32 %v648_v47  ;;  %1812 = vmatprep.subr.bf16.mxu1 %v1894_v44  ;;  %1792 = vmatprep.subr.bf16.mxu0 %v1900_v15 }
 0x106   : > { %v1914_v50 = vpop.eup %1913  ;;  %1793 = vmatpush3.bf16.msra.mxu0 %v1900_v15 }
 0x107   : > { %v1916_v51 = vpop.eup %1915  ;;  %v1760_v52 = vpop.f32.mrb[12].mxu0  ;;  %v694_v53 = vpack.c.bf16 %v1914_v50, %v1910_v48 }
 0x108   : > { %v669_v54 = vadd.f32 %v1760_v52, %v2217_v16  ;;  %v660_v55 = vpop.f32.mrb[13].mxu0  ;;  %v693_v56 = vpack.c.bf16 %v1916_v51, %v1912_v49  ;;  %1813 = vmatpush3.bf16.msra.mxu1 %v1894_v44 }
 0x109   : > { %v661_v57 = vadd.f32 %v2217_v16, %v660_v55  ;;  %v1761_v58 = vpop.f32.mrb[14].mxu0  ;;  %1814 = vmatprep.subr.bf16.mxu1 %v1895_v12 }
 0x10a   : > { %1925 = vtanh.f32 %v669_v54  ;;  %v672_v59 = vadd.f32 %v1761_v58, %v2217_v16  ;;  %v663_v60 = vpop.f32.mrb[15].mxu0  ;;  %1774 = vmatprep.mubr.msk.bf16.mxu1 %vm738_vm2, %v693_v56 }
 0x10b   : > { %1927 = vtanh.f32 %v661_v57  ;;  %v664_v61 = vadd.f32 %v2217_v16, %v663_v60  ;;  %1775 = vmatmul.mubr.msk.bf16.gmra.mrb[4].mxu1 %vm738_vm2, %v694_v53  ;;  %v2267_v16 = vld [vmem:[%s2559_s6] ss:$0 sm:$0xff] }
 0x10c   : > { %v1918_v62 = vpop.eup %1917  ;;  %1929 = vtanh.f32 %v672_v59  ;;  %1815 = vmatpush3.bf16.msra.mxu1 %v1895_v12 }
 0x10d   : > { %v1920_v63 = vpop.eup %1919  ;;  %1931 = vtanh.f32 %v664_v61  ;;  %1816 = vmatprep.subr.bf16.mxu1 %v1898_v14 }
 0x10e   : > { %v1922_v0 = vpop.eup %1921 }
 0x10f   : > { %v1924_v1 = vpop.eup %1923  ;;  %v696_v2 = vpack.c.bf16 %v1922_v0, %v1918_v62 }
 0x110   : > { %v695_v3 = vpack.c.bf16 %v1924_v1, %v1920_v63  ;;  %1817 = vmatpush3.bf16.msra.mxu1 %v1898_v14 }
 0x112   : > { %1778 = vmatprep.mubr.msk.bf16.mxu1 %vm738_vm2, %v695_v3 }
 0x113   : > { %1779 = vmatmul.mubr.msk.bf16.gmra.mrb[8].mxu1 %vm738_vm2, %v696_v2 }
 0x114   : > { %v1926_v4 = vpop.eup %1925 }
 0x115   : > { %v1928_v5 = vpop.eup %1927 }
 0x116   : > { %v1930_v6 = vpop.eup %1929 }
 0x117   : > { %v1932_v7 = vpop.eup %1931  ;;  %v698_v8 = vpack.c.bf16 %v1930_v6, %v1926_v4 }
 0x118   : > { %v697_v9 = vpack.c.bf16 %v1932_v7, %v1928_v5 }
 0x11a   : > { %1782 = vmatprep.mubr.msk.bf16.mxu1 %vm738_vm2, %v697_v9  ;;  %v2304_v9 = vld [vmem:[%s2563_s10] ss:$0 sm:$0xff] }
 0x11b   : > { %1783 = vmatmul.mubr.msk.bf16.gmra.mrb[12].mxu1 %vm738_vm2, %v698_v8 }
 0x1d6   : > { %v1772_v17 = vpop.f32.mrb[0].mxu1 }
 0x1d7   : > { %v806_v18 = vadd.f32 %v1772_v17, %v2267_v16  ;;  %v797_v19 = vpop.f32.mrb[1].mxu1 }
 0x1d8   : > { %v798_v20 = vadd.f32 %v2267_v16, %v797_v19  ;;  %v1773_v21 = vpop.f32.mrb[2].mxu1 }
 0x1d9   : > { %1933 = vtanh.f32 %v806_v18  ;;  %v809_v22 = vadd.f32 %v1773_v21, %v2267_v16  ;;  %v800_v23 = vpop.f32.mrb[3].mxu1 }
 0x1da   : > { %1935 = vtanh.f32 %v798_v20  ;;  %v801_v24 = vadd.f32 %v2267_v16, %v800_v23 }
 0x1db   : > { %1937 = vtanh.f32 %v809_v22 }
 0x1dc   : > { %1939 = vtanh.f32 %v801_v24 }
 0x1de   : > { %v1776_v25 = vpop.f32.mrb[4].mxu1 }
 0x1df   : > { %v822_v26 = vadd.f32 %v1776_v25, %v2267_v16  ;;  %v813_v27 = vpop.f32.mrb[5].mxu1 }
 0x1e0   : > { %v814_v28 = vadd.f32 %v2267_v16, %v813_v27  ;;  %v1777_v29 = vpop.f32.mrb[6].mxu1 }
 0x1e1   : > { %1941 = vtanh.f32 %v822_v26  ;;  %v825_v30 = vadd.f32 %v1777_v29, %v2267_v16  ;;  %v816_v31 = vpop.f32.mrb[7].mxu1 }
 0x1e2   : > { %1943 = vtanh.f32 %v814_v28  ;;  %v817_v32 = vadd.f32 %v2267_v16, %v816_v31  ;;  %v2318_v31 = vld [vmem:[%s2561_s8] ss:$0 sm:$0xff] }
 0x1e3   : > { %v1934_v33 = vpop.eup %1933  ;;  %1945 = vtanh.f32 %v825_v30 }
 0x1e4   : > { %v1936_v34 = vpop.eup %1935  ;;  %1947 = vtanh.f32 %v817_v32 }
 0x1e5   : > { %v1938_v35 = vpop.eup %1937 }
 0x1e6   : > { %v1940_v36 = vpop.eup %1939  ;;  %v877_v37 = vpack.c.bf16 %v1938_v35, %v1934_v33  ;;  %v1780_v38 = vpop.f32.mrb[8].mxu1 }
 0x1e7   : > { %v838_v39 = vadd.f32 %v1780_v38, %v2267_v16  ;;  %v829_v40 = vpop.f32.mrb[9].mxu1  ;;  %v876_v41 = vpack.c.bf16 %v1940_v36, %v1936_v34 }
 0x1e8   : > { %v830_v42 = vadd.f32 %v2267_v16, %v829_v40  ;;  %v1781_v43 = vpop.f32.mrb[10].mxu1 }
 0x1e9   : > { %1949 = vtanh.f32 %v838_v39  ;;  %v841_v44 = vadd.f32 %v1781_v43, %v2267_v16  ;;  %v832_v45 = vpop.f32.mrb[11].mxu1  ;;  %1794 = vmatprep.mubr.msk.bf16.mxu0 %vm738_vm2, %v876_v41  ;;  %1818 = vmatprep.mubr.msk.bf16.mxu1 %vm738_vm2, %v876_v41 }
 0x1ea   : > { %1951 = vtanh.f32 %v830_v42  ;;  %v833_v46 = vadd.f32 %v2267_v16, %v832_v45  ;;  %1795 = vmatmul.mubr.msk.bf16.vlgmr.msra.gmra.mrb[16].mxu0 %vm738_vm2, %v877_v37  ;;  %1819 = vmatmul.mubr.msk.bf16.vlgmr.msra.gmra.mrb[16].mxu1 %vm738_vm2, %v877_v37 }
 0x1eb   : > { %v1942_v47 = vpop.eup %1941  ;;  %1953 = vtanh.f32 %v841_v44 }
 0x1ec   : > { %v1944_v48 = vpop.eup %1943  ;;  %1955 = vtanh.f32 %v833_v46 }
 0x1ed   : > { %v1946_v49 = vpop.eup %1945 }
 0x1ee   : > { %v1948_v50 = vpop.eup %1947  ;;  %v1784_v51 = vpop.f32.mrb[12].mxu1  ;;  %v879_v52 = vpack.c.bf16 %v1946_v49, %v1942_v47 }
 0x1ef   : > { %v854_v53 = vadd.f32 %v1784_v51, %v2267_v16  ;;  %v845_v54 = vpop.f32.mrb[13].mxu1  ;;  %v878_v55 = vpack.c.bf16 %v1948_v50, %v1944_v48  ;;  %v1182_v48 = vld [vmem:[%s2326_s17 + $0x10] sm:$0xff] }
 0x1f0   : > { %v846_v56 = vadd.f32 %v2267_v16, %v845_v54  ;;  %v1785_v57 = vpop.f32.mrb[14].mxu1  ;;  %v1183_v54 = vld [vmem:[%s2326_s17 + $0x18] sm:$0xff] }
 0x1f1   : > { %1957 = vtanh.f32 %v854_v53  ;;  %v857_v58 = vadd.f32 %v1785_v57, %v2267_v16  ;;  %v848_v59 = vpop.f32.mrb[15].mxu1  ;;  %1798 = vmatprep.mubr.msk.bf16.mxu0 %vm738_vm2, %v878_v55  ;;  %1822 = vmatprep.mubr.msk.bf16.mxu1 %vm738_vm2, %v878_v55  ;;  %v1180_v53 = vld [vmem:[%s2326_s17] sm:$0xff] }
 0x1f2   : > { %1959 = vtanh.f32 %v846_v56  ;;  %v849_v60 = vadd.f32 %v2267_v16, %v848_v59  ;;  %1799 = vmatmul.mubr.msk.bf16.gmra.mrb[20].mxu0 %vm738_vm2, %v879_v52  ;;  %1823 = vmatmul.mubr.msk.bf16.gmra.mrb[20].mxu1 %vm738_vm2, %v879_v52  ;;  %v1181_v59 = vld [vmem:[%s2326_s17 + $0x8] sm:$0xff] }
 0x1f3   : > { %v1950_v61 = vpop.eup %1949  ;;  %1961 = vtanh.f32 %v857_v58 }
 0x1f4   : > { %v1952_v62 = vpop.eup %1951  ;;  %1963 = vtanh.f32 %v849_v60 }
 0x1f5   : > { %v1954_v63 = vpop.eup %1953 }
 0x1f6   : > { %v1956_v0 = vpop.eup %1955  ;;  %v881_v1 = vpack.c.bf16 %v1954_v63, %v1950_v61 }
 0x1f7   : > { %v880_v2 = vpack.c.bf16 %v1956_v0, %v1952_v62 }
 0x1f9   : > { %1802 = vmatprep.mubr.msk.bf16.mxu0 %vm738_vm2, %v880_v2  ;;  %1826 = vmatprep.mubr.msk.bf16.mxu1 %vm738_vm2, %v880_v2 }
 0x1fa   : > { %1803 = vmatmul.mubr.msk.bf16.gmra.mrb[24].mxu0 %vm738_vm2, %v881_v1  ;;  %1827 = vmatmul.mubr.msk.bf16.gmra.mrb[24].mxu1 %vm738_vm2, %v881_v1 }
 0x1fb   : > { %v1958_v3 = vpop.eup %1957 }
 0x1fc   : > { %v1960_v4 = vpop.eup %1959 }
 0x1fd   : > { %v1962_v5 = vpop.eup %1961 }
 0x1fe   : > { %v1964_v6 = vpop.eup %1963  ;;  %v883_v7 = vpack.c.bf16 %v1962_v5, %v1958_v3 }
 0x1ff   : > { %v882_v8 = vpack.c.bf16 %v1964_v6, %v1960_v4 }
 0x201   : > { %1806 = vmatprep.mubr.msk.bf16.mxu0 %vm738_vm2, %v882_v8  ;;  %1830 = vmatprep.mubr.msk.bf16.mxu1 %vm738_vm2, %v882_v8 }
 0x202   : > { %1807 = vmatmul.mubr.msk.bf16.gmra.mrb[28].mxu0 %vm738_vm2, %v883_v7  ;;  %1831 = vmatmul.mubr.msk.bf16.gmra.mrb[28].mxu1 %vm738_vm2, %v883_v7 }
 0x2bd   : > { %v1796_v10 = vpop.f32.mrb[16].mxu0  ;;  %v1820_v11 = vpop.f32.mrb[16].mxu1 }
 0x2be   : > { %v1126_v12 = vadd.f32 %v1820_v11, %v2304_v9  ;;  %v981_v13 = vpop.f32.mrb[17].mxu0  ;;  %v1117_v14 = vpop.f32.mrb[17].mxu1  ;;  %v990_v43 = vadd.f32 %v1796_v10, %v2318_v31 }
 0x2bf   : > { %v1118_v15 = vadd.f32 %v2304_v9, %v1117_v14  ;;  %v1797_v16 = vpop.f32.mrb[18].mxu0  ;;  %v1821_v17 = vpop.f32.mrb[18].mxu1  ;;  %v982_v49 = vadd.f32 %v2318_v31, %v981_v13 }
 0x2c0   : > { %v1214_v18 = vmul.f32 -0.5, %v1126_v12  ;;  %v1129_v19 = vadd.f32 %v1821_v17, %v2304_v9  ;;  %v984_v20 = vpop.f32.mrb[19].mxu0  ;;  %v1120_v21 = vpop.f32.mrb[19].mxu1  ;;  %v1299_v26 = vsel %vm1276_vm3, %v1126_v12, 0.0  ;;  %v993_v50 = vadd.f32 %v1797_v16, %v2318_v31 }
 0x2c1   : > { %v1212_v22 = vmul.f32 -0.5, %v1118_v15  ;;  %v1121_v23 = vadd.f32 %v2304_v9, %v1120_v21  ;;  %1300 = vadd.xlane.f32.xlu1 %v1299_v26  ;;  %v1293_v29 = vsel %vm1276_vm3, %v1118_v15, 0.0  ;;  %v985_v55 = vadd.f32 %v2318_v31, %v984_v20 }
 0x2c2   : > { %v1232_v24 = vmul.f32 1.442695, %v1214_v18  ;;  %v1215_v25 = vmul.f32 -0.5, %v1129_v19  ;;  %1294 = vadd.xlane.f32.xlu0 %v1293_v29  ;;  %v1302_v35 = vsel %vm1276_vm3, %v1129_v19, 0.0  ;;  %v1198_v63 = vsub.f32 %v1182_v48, %v990_v43 }
 0x2c3   : > { %v1228_v27 = vmul.f32 1.442695, %v1212_v22  ;;  %v1213_v28 = vmul.f32 -0.5, %v1121_v23  ;;  %v1296_v40 = vsel %vm1276_vm3, %v1121_v23, 0.0  ;;  %v1196_v1 = vsub.f32 %v1180_v53, %v982_v49 }
 0x2c4   : > { %1965 = vpow2.f32 %v1232_v24  ;;  %v1234_v30 = vmul.f32 1.442695, %v1215_v25  ;;  %v1199_v2 = vsub.f32 %v1183_v54, %v993_v50  ;;  %v1197_v7 = vsub.f32 %v1181_v59, %v985_v55 }
 0x2c5   : > { %1967 = vpow2.f32 %v1228_v27  ;;  %v1230_v32 = vmul.f32 1.442695, %v1213_v28  ;;  %v2320_v33 = vpop.f32.mrb[20].mxu0  ;;  %v1824_v34 = vpop.f32.mrb[20].mxu1  ;;  %1303 = vadd.xlane.f32.xlu1 %v1302_v35  ;;  %v1186_v28 = vld [vmem:[%s2326_s17 + $0x30] sm:$0xff]  ;;  %v1187_v35 = vld [vmem:[%s2326_s17 + $0x38] sm:$0xff] }
 0x2c6   : > { %1969 = vpow2.f32 %v1234_v30  ;;  %v1142_v36 = vadd.f32 %v1824_v34, %v2304_v9  ;;  %v1133_v37 = vpop.f32.mrb[21].mxu1  ;;  %v2330_v38 = vpop.f32.mrb[21].mxu0  ;;  %1297 = vadd.xlane.f32.xlu0 %v1296_v40  ;;  %v1006_v21 = vadd.f32 %v2320_v33, %v2318_v31  ;;  %v1184_v34 = vld [vmem:[%s2326_s17 + $0x20] sm:$0xff]  ;;  %v1185_v40 = vld [vmem:[%s2326_s17 + $0x28] sm:$0xff] }
 0x2c7   : > { %1971 = vpow2.f32 %v1230_v32  ;;  %v1134_v39 = vadd.f32 %v2304_v9, %v1133_v37  ;;  %v2334_v41 = vpop.f32.mrb[22].mxu0  ;;  %v1825_v42 = vpop.f32.mrb[22].mxu1  ;;  %v998_v29 = vadd.f32 %v2318_v31, %v2330_v38 }
 0x2c8   : > { %v1218_v44 = vmul.f32 -0.5, %v1142_v36  ;;  %v1145_v45 = vadd.f32 %v1825_v42, %v2304_v9  ;;  %v2338_v46 = vpop.f32.mrb[23].mxu0  ;;  %v1136_v47 = vpop.f32.mrb[23].mxu1  ;;  %v1311_v58 = vsel %vm1276_vm3, %v1142_v36, 0.0  ;;  %v1009_v30 = vadd.f32 %v2334_v41, %v2318_v31 }
 0x2c9   : > { %v1216_v51 = vmul.f32 -0.5, %v1134_v39  ;;  %v1137_v52 = vadd.f32 %v2304_v9, %v1136_v47  ;;  %v1305_v11 = vsel %vm1276_vm3, %v1134_v39, 0.0  ;;  %v1001_v36 = vadd.f32 %v2318_v31, %v2338_v46 }
 0x2ca   : > { %v1240_v56 = vmul.f32 1.442695, %v1218_v44  ;;  %v1219_v57 = vmul.f32 -0.5, %v1145_v45  ;;  %v1314_v62 = vsel %vm1276_vm3, %v1145_v45, 0.0  ;;  %1312 = vadd.xlane.f32.xlu0 %v1311_v58  ;;  %v1202_v41 = vsub.f32 %v1186_v28, %v1006_v21 }
 0x2cb   : > { %v1236_v60 = vmul.f32 1.442695, %v1216_v51  ;;  %v1217_v61 = vmul.f32 -0.5, %v1137_v52  ;;  %1315 = vadd.xlane.f32.xlu1 %v1314_v62  ;;  %v1308_v17 = vsel %vm1276_vm3, %v1137_v52, 0.0  ;;  %v1200_v47 = vsub.f32 %v1184_v34, %v998_v29  ;;  %v1189_v34 = vld [vmem:[%s2326_s17 + $0x48] sm:$0xff] }
 0x2cc   : > { %1973 = vpow2.f32 %v1240_v56  ;;  %v1242_v0 = vmul.f32 1.442695, %v1219_v57  ;;  %v1203_v46 = vsub.f32 %v1187_v35, %v1009_v30  ;;  %v1201_v52 = vsub.f32 %v1185_v40, %v1001_v36 }
 0x2cd   : > { %1975 = vpow2.f32 %v1236_v60  ;;  %v1238_v3 = vmul.f32 1.442695, %v1217_v61  ;;  %v2350_v4 = vpop.f32.mrb[24].mxu0  ;;  %v1828_v5 = vpop.f32.mrb[24].mxu1 }
 0x2ce   : > { %v1966_v6 = vpop.eup %1965  ;;  %1977 = vpow2.f32 %v1242_v0  ;;  %v1158_v8 = vadd.f32 %v1828_v5, %v2304_v9  ;;  %v1149_v10 = vpop.f32.mrb[25].mxu1  ;;  %1306 = vadd.xlane.f32.xlu0 %v1305_v11  ;;  %v1022_v11 = vadd.f32 %v2350_v4, %v2318_v31 }
 0x2cf   : > { %v2360_v12 = vpop.f32.mrb[25].mxu0  ;;  %v1968_v13 = vpop.eup %1967  ;;  %v1262_v14 = vmul.f32 %v1966_v6, %v1198_v63  ;;  %1979 = vpow2.f32 %v1238_v3  ;;  %v1150_v15 = vadd.f32 %v2304_v9, %v1149_v10  ;;  %1309 = vadd.xlane.f32.xlu1 %v1308_v17  ;;  %v2061_v63 = vmov 0  }
 0x2d0   : > { %v1829_v16 = vpop.f32.mrb[26].mxu1  ;;  %v2364_v18 = vpop.f32.mrb[26].mxu0  ;;  %v1260_v20 = vmul.f32 %v1968_v13, %v1196_v1  ;;  %v1222_v22 = vmul.f32 -0.5, %v1158_v8  ;;  %v1323_v43 = vsel %vm1276_vm3, %v1158_v8, 0.0  ;;  %1877 = vset.pattern.permute.xlu1 %v2061_v63  ;;  %1878 = vset.pattern.permute.xlu0 %v2061_v63 }
 0x2d1   : > { %v1970_v19 = vpop.eup %1969  ;;  %v1161_v23 = vadd.f32 %v1829_v16, %v2304_v9  ;;  %v2369_v24 = vpop.f32.mrb[27].mxu0  ;;  %1279 = vst.msk [vmem:[%s2356_s26 + $0x10] sm:$0xff] %vm1276_vm3, %v1262_v14  ;;  %v1220_v32 = vmul.f32 -0.5, %v1150_v15  ;;  %v1317_v60 = vsel %vm1276_vm3, %v1150_v15, 0.0  ;;  %v1190_v15 = vld [vmem:[%s2326_s17 + $0x50] sm:$0xff]  ;;  %v1014_v16 = vadd.f32 %v2318_v31, %v2360_v12 }
 0x2d2   : > { %v1152_v25 = vpop.f32.mrb[27].mxu1  ;;  %v1972_v26 = vpop.eup %1971  ;;  %v1263_v27 = vmul.f32 %v1970_v19, %v1199_v2  ;;  %1277 = vst.msk [vmem:[%s2356_s26] sm:$0xff] %vm1276_vm3, %v1260_v20  ;;  %v1248_v37 = vmul.f32 1.442695, %v1222_v22  ;;  %1324 = vadd.xlane.f32.xlu0 %v1323_v43  ;;  %v1188_v20 = vld [vmem:[%s2326_s17 + $0x40] sm:$0xff]  ;;  %v1025_v4 = vadd.f32 %v2364_v18, %v2318_v31  ;;  %v1194_v43 = vld [vmem:[%s2326_s17 + $0x70] sm:$0xff] }
 0x2d3   : > { %v1261_v33 = vmul.f32 %v1972_v26, %v1197_v7  ;;  %v1223_v39 = vmul.f32 -0.5, %v1161_v23  ;;  %v1244_v42 = vmul.f32 1.442695, %v1220_v32  ;;  %v1153_v38 = vadd.f32 %v2304_v9, %v1152_v25  ;;  %v1191_v25 = vld [vmem:[%s2326_s17 + $0x58] sm:$0xff] }
 0x2d4   : > { %1280 = vst.msk [vmem:[%s2356_s26 + $0x18] sm:$0xff] %vm1276_vm3, %v1263_v27  ;;  %1981 = vpow2.f32 %v1248_v37  ;;  %v1326_v45 = vsel %vm1276_vm3, %v1161_v23, 0.0  ;;  %v1206_v27 = vsub.f32 %v1190_v15, %v1022_v11  ;;  %v1204_v29 = vsub.f32 %v1188_v20, %v1014_v16  ;;  %v1358_v15 = vld [vmem:[%s2462_s19 + $0x8] sm:$0xff] }
 0x2d5   : > { %1278 = vst.msk [vmem:[%s2356_s26 + $0x8] sm:$0xff] %vm1276_vm3, %v1261_v33  ;;  %v1250_v44 = vmul.f32 1.442695, %v1223_v39  ;;  %1983 = vpow2.f32 %v1244_v42  ;;  %v1221_v48 = vmul.f32 -0.5, %v1153_v38  ;;  %1327 = vadd.xlane.f32.xlu1 %v1326_v45  ;;  %v2392_v49 = vpop.f32.mrb[28].mxu0  ;;  %v1832_v50 = vpop.f32.mrb[28].mxu1  ;;  %v1207_v33 = vsub.f32 %v1191_v25, %v1025_v4 }
 0x2d6   : > { %v1974_v51 = vpop.eup %1973  ;;  %v1174_v53 = vadd.f32 %v1832_v50, %v2304_v9  ;;  %v1165_v54 = vpop.f32.mrb[29].mxu1  ;;  %1318 = vadd.xlane.f32.xlu0 %v1317_v60  ;;  %v1320_v5 = vsel %vm1276_vm3, %v1153_v38, 0.0  ;;  %v1038_v42 = vadd.f32 %v2392_v49, %v2318_v31  ;;  %v1192_v45 = vld [vmem:[%s2326_s17 + $0x60] sm:$0xff]  ;;  %v1363_v4 = vld [vmem:[%s2462_s19 + $0x30] sm:$0xff] }
 0x2d7   : > { %1985 = vpow2.f32 %v1250_v44  ;;  %v2395_v55 = vpop.f32.mrb[29].mxu0  ;;  %v1976_v56 = vpop.eup %1975  ;;  %v1266_v57 = vmul.f32 %v1974_v51, %v1202_v41  ;;  %v1246_v58 = vmul.f32 1.442695, %v1221_v48  ;;  %v1166_v59 = vadd.f32 %v2304_v9, %v1165_v54  ;;  %v1195_v48 = vld [vmem:[%s2326_s17 + $0x78] sm:$0xff] }
 0x2d8   : > { %v1833_v61 = vpop.f32.mrb[30].mxu1  ;;  %v2399_v62 = vpop.f32.mrb[30].mxu0  ;;  %v1264_v1 = vmul.f32 %v1976_v56, %v1200_v47  ;;  %v1226_v2 = vmul.f32 -0.5, %v1174_v53  ;;  %v1335_v36 = vsel %vm1276_vm3, %v1174_v53, 0.0  ;;  %v1030_v41 = vadd.f32 %v2318_v31, %v2395_v55  ;;  %v1193_v56 = vld [vmem:[%s2326_s17 + $0x68] sm:$0xff]  ;;  %s2483_s17 = scalar_lea.vmem [#allocation2], %s1623_s16 }
 0x2d9   : > { %v1978_v0 = vpop.eup %1977  ;;  %v1177_v3 = vadd.f32 %v1833_v61, %v2304_v9  ;;  %v2403_v6 = vpop.f32.mrb[31].mxu0  ;;  %1283 = vst.msk [vmem:[%s2356_s26 + $0x30] sm:$0xff] %vm1276_vm3, %v1266_v57  ;;  %1987 = vpow2.f32 %v1246_v58  ;;  %v1224_v13 = vmul.f32 -0.5, %v1166_v59  ;;  %1321 = vadd.xlane.f32.xlu1 %v1320_v5  ;;  %v1329_v23 = vsel %vm1276_vm3, %v1166_v59, 0.0  ;;  %s1508_s20 = sshll.u32 %s2483_s17, 4  ;;  %s2507_s20 = int_to_ptr.vmem [resolvable:$true] %s1508_s20 }
 0x2da   : > { %v1168_v7 = vpop.f32.mrb[31].mxu1  ;;  %v1980_v8 = vpop.eup %1979  ;;  %v1267_v10 = vmul.f32 %v1978_v0, %v1203_v46  ;;  %1281 = vst.msk [vmem:[%s2356_s26 + $0x20] sm:$0xff] %vm1276_vm3, %v1264_v1  ;;  %v1256_v17 = vmul.f32 1.442695, %v1226_v2  ;;  %1330 = vadd.xlane.f32.xlu0 %v1329_v23  ;;  %v1041_v47 = vadd.f32 %v2399_v62, %v2318_v31  ;;  %v1210_v49 = vsub.f32 %v1194_v43, %v1038_v42  ;;  %v1357_v1 = vld [vmem:[%s2462_s19] sm:$0xff]  ;;  %s1997_s16 = scalar_lea.vmem %s2507_s20, 2048  ;;  %p2004_p0 = scmp.lt.s32.totalorder %s2507_s20, %s2002_s0 }
 0x2db   : > { %v1265_v14 = vmul.f32 %v1980_v8, %v1201_v52  ;;  %v1227_v19 = vmul.f32 -0.5, %v1177_v3  ;;  %v1252_v21 = vmul.f32 1.442695, %v1224_v13  ;;  %v1169_v22 = vadd.f32 %v2304_v9, %v1168_v7  ;;  %v1360_v7 = vld [vmem:[%s2462_s19 + $0x18] sm:$0xff]  ;;  %p1998_p11 = scmp.ne.s32.totalorder %s2507_s20, %s1997_s16  ;;  %p2005_p1 = scmp.lt.s32.totalorder %s2003_s18, %s1997_s16 }
 0x2dc   : > { %1284 = vst.msk [vmem:[%s2356_s26 + $0x38] sm:$0xff] %vm1276_vm3, %v1267_v10  ;;  %1989 = vpow2.f32 %v1256_v17  ;;  %v1338_v12 = vsel %vm1276_vm3, %v1177_v3, 0.0  ;;  %v1017_v9 = vadd.f32 %v2318_v31, %v2369_v24  ;;  %v1208_v51 = vsub.f32 %v1192_v45, %v1030_v41  ;;  %v1367_v41 = vld [vmem:[%s2462_s19 + $0x50] sm:$0xff]  ;;  %v1370_v45 = vld [vmem:[%s2462_s19 + $0x68] sm:$0xff] }
 0x2dd   : > { %1282 = vst.msk [vmem:[%s2356_s26 + $0x28] sm:$0xff] %vm1276_vm3, %v1265_v14  ;;  %v1258_v26 = vmul.f32 1.442695, %v1227_v19  ;;  %1991 = vpow2.f32 %v1252_v21  ;;  %v1225_v28 = vmul.f32 -0.5, %v1169_v22  ;;  %1339 = vadd.xlane.f32.xlu1 %v1338_v12  ;;  %v1332_v40 = vsel %vm1276_vm3, %v1169_v22, 0.0  ;;  %p1999_p12 = pnand %p1998_p11, %p2168_p5  ;;  %p2006_p2 = por %p2005_p1, %p2004_p0 }
 0x2de   : > { %v1982_v18 = vpop.eup %1981  ;;  %1336 = vadd.xlane.f32.xlu0 %v1335_v36  ;;  %v1205_v38 = vsub.f32 %v1189_v34, %v1017_v9  ;;  %v1033_v52 = vadd.f32 %v2318_v31, %v2403_v6  ;;  %v1211_v55 = vsub.f32 %v1195_v48, %v1041_v47  ;;  %v1359_v31 = vld [vmem:[%s2462_s19 + $0x10] sm:$0xff] }
 0x2df   : > { %1993 = vpow2.f32 %v1258_v26  ;;  %v1984_v30 = vpop.eup %1983  ;;  %v1270_v32 = vmul.f32 %v1982_v18, %v1206_v27  ;;  %v1254_v35 = vmul.f32 1.442695, %v1225_v28  ;;  %v1361_v26 = vld [vmem:[%s2462_s19 + $0x20] sm:$0xff]  ;;  %v1368_v27 = vld [vmem:[%s2462_s19 + $0x58] sm:$0xff]  ;;  %p2000_p13 = pneg %p1999_p12 }
 0x2e0   : > { %v1268_v39 = vmul.f32 %v1984_v30, %v1204_v29  ;;  %v1209_v60 = vsub.f32 %v1193_v56, %v1033_v52  ;;  %v1364_v30 = vld [vmem:[%s2462_s19 + $0x38] sm:$0xff]  ;;  %v1369_v56 = vld [vmem:[%s2462_s19 + $0x60] sm:$0xff] }
 0x2e1   : > { %v1986_v37 = vpop.eup %1985  ;;  %1287 = vst.msk [vmem:[%s2356_s26 + $0x50] sm:$0xff] %vm1276_vm3, %v1270_v32  ;;  %1995 = vpow2.f32 %v1254_v35  ;;  %1333 = vadd.xlane.f32.xlu1 %v1332_v40  ;;  %p2007_p3 = pnand %p2006_p2, %p2000_p13 }
 0x2e2   : > { %v1271_v24 = vmul.f32 %v1986_v37, %v1207_v33  ;;  %1285 = vst.msk [vmem:[%s2356_s26 + $0x40] sm:$0xff] %vm1276_vm3, %v1268_v39  ;;  %v1366_v33 = vld [vmem:[%s2462_s19 + $0x48] sm:$0xff] }
 0x2e3   : > { %v1988_v44 = vpop.eup %1987  ;;  %v1362_v39 = vld [vmem:[%s2462_s19 + $0x28] sm:$0xff] }
 0x2e4   : > { %1288 = vst.msk [vmem:[%s2356_s26 + $0x58] sm:$0xff] %vm1276_vm3, %v1271_v24  ;;  %v1269_v46 = vmul.f32 %v1988_v44, %v1205_v38 }
 0x2e6   : > { %v1990_v50 = vpop.eup %1989  ;;  %1286 = vst.msk [vmem:[%s2356_s26 + $0x48] sm:$0xff] %vm1276_vm3, %v1269_v46 }
 0x2e7   : > { %v1992_v53 = vpop.eup %1991  ;;  %v1274_v54 = vmul.f32 %v1990_v50, %v1210_v49  ;;  %v1365_v50 = vld [vmem:[%s2462_s19 + $0x40] sm:$0xff] }
 0x2e8   : > { %v1272_v58 = vmul.f32 %v1992_v53, %v1208_v51  ;;  %v1372_v53 = vld [vmem:[%s2462_s19 + $0x78] sm:$0xff] }
 0x2e9   : > { %v1994_v57 = vpop.eup %1993  ;;  %1291 = vst.msk [vmem:[%s2356_s26 + $0x70] sm:$0xff] %vm1276_vm3, %v1274_v54 }
 0x2ea   : > { %v1275_v59 = vmul.f32 %v1994_v57, %v1211_v55  ;;  %1289 = vst.msk [vmem:[%s2356_s26 + $0x60] sm:$0xff] %vm1276_vm3, %v1272_v58 }
 0x2eb   : > { %v1996_v61 = vpop.eup %1995 }
 0x2ec   : > { %1292 = vst.msk [vmem:[%s2356_s26 + $0x78] sm:$0xff] %vm1276_vm3, %v1275_v59  ;;  %v1273_v62 = vmul.f32 %v1996_v61, %v1209_v60  ;;  %v1371_v61 = vld [vmem:[%s2462_s19 + $0x70] sm:$0xff]  ;;  %s2512_s19 = scalar_lea.sflag [#allocation3], %s445_s28 }
 0x2ee   : > { %1290 = vst.msk [vmem:[%s2356_s26 + $0x68] sm:$0xff] %vm1276_vm3, %v1273_v62 }
 0x34e   : > { %v1301_v63 = vpop.xlane.xlu1 %1300 }
 0x34f   : > { %v1343_v0 = vmul.f32 -0.5, %v1301_v63  ;;  %v1295_v2 = vpop.xlane.xlu0 %1294 }
 0x350   : > { %v1341_v3 = vmul.f32 -0.5, %v1295_v2 }
 0x351   : > { %v1375_v5 = vadd.f32 %v1359_v31, %v1343_v0 }
 0x352   : > { %v1373_v6 = vadd.f32 %v1357_v1, %v1341_v3  ;;  %v1304_v8 = vpop.xlane.xlu1 %1303 }
 0x353   : > { %v1344_v10 = vmul.f32 -0.5, %v1304_v8  ;;  %1401 = vperm.xlu1 %1877, %v1375_v5   ;;  %v1298_v11 = vpop.xlane.xlu0 %1297 }
 0x354   : > { %1391 = vperm.xlu0 %1878, %v1373_v6   ;;  %v1342_v14 = vmul.f32 -0.5, %v1298_v11 }
 0x355   : > { %v1376_v13 = vadd.f32 %v1360_v7, %v1344_v10 }
 0x356   : > { %v1374_v19 = vadd.f32 %v1358_v15, %v1342_v14 }
 0x357   : > { %1406 = vperm.xlu1 %1877, %v1376_v13   ;;  %v1313_v16 = vpop.xlane.xlu0 %1312 }
 0x358   : > { %v1316_v17 = vpop.xlane.xlu1 %1315  ;;  %v1347_v20 = vmul.f32 -0.5, %v1313_v16 }
 0x359   : > { %v1348_v18 = vmul.f32 -0.5, %v1316_v17 }
 0x35a   : > { %v1379_v23 = vadd.f32 %v1363_v4, %v1347_v20 }
 0x35b   : > { %1396 = vperm.xlu1 %1877, %v1374_v19   ;;  %v1307_v21 = vpop.xlane.xlu0 %1306  ;;  %v1380_v35 = vadd.f32 %v1364_v30, %v1348_v18 }
 0x35c   : > { %v1310_v22 = vpop.xlane.xlu1 %1309  ;;  %v1345_v25 = vmul.f32 -0.5, %v1307_v21 }
 0x35d   : > { %v1346_v36 = vmul.f32 -0.5, %v1310_v22 }
 0x35e   : > { %v1377_v29 = vadd.f32 %v1361_v26, %v1345_v25 }
 0x35f   : > { %1421 = vperm.xlu1 %1877, %v1379_v23   ;;  %v1325_v12 = vpop.xlane.xlu0 %1324  ;;  %v1378_v38 = vadd.f32 %v1362_v39, %v1346_v36 }
 0x360   : > { %v1351_v43 = vmul.f32 -0.5, %v1325_v12 }
 0x362   : > { %v1328_v28 = vpop.xlane.xlu1 %1327  ;;  %v1383_v46 = vadd.f32 %v1367_v41, %v1351_v43 }
 0x363   : > { %v1352_v9 = vmul.f32 -0.5, %v1328_v28  ;;  %1411 = vperm.xlu1 %1877, %v1377_v29   ;;  %v1319_v40 = vpop.xlane.xlu0 %1318 }
 0x364   : > { %v1349_v48 = vmul.f32 -0.5, %v1319_v40 }
 0x365   : > { %v1384_v32 = vadd.f32 %v1368_v27, %v1352_v9 }
 0x366   : > { %v1322_v34 = vpop.xlane.xlu1 %1321  ;;  %v1381_v54 = vadd.f32 %v1365_v50, %v1349_v48 }
 0x367   : > { %v1350_v37 = vmul.f32 -0.5, %v1322_v34  ;;  %1446 = vperm.xlu0 %1878, %v1384_v32   ;;  %1426 = vperm.xlu1 %1877, %v1380_v35   ;;  %v1331_v44 = vpop.xlane.xlu0 %1330 }
 0x368   : > { %v1353_v55 = vmul.f32 -0.5, %v1331_v44 }
 0x369   : > { %v1382_v24 = vadd.f32 %v1366_v33, %v1350_v37 }
 0x36a   : > { %v1340_v42 = vpop.xlane.xlu1 %1339  ;;  %v1385_v59 = vadd.f32 %v1369_v56, %v1353_v55 }
 0x36b   : > { %1436 = vperm.xlu0 %1878, %v1382_v24   ;;  %1416 = vperm.xlu1 %1877, %v1378_v38   ;;  %v1356_v51 = vmul.f32 -0.5, %v1340_v42  ;;  %v1337_v57 = vpop.xlane.xlu0 %1336 }
 0x36c   : > { %v1355_v60 = vmul.f32 -0.5, %v1337_v57 }
 0x36d   : > { %v1388_v58 = vadd.f32 %v1372_v53, %v1356_v51 }
 0x36e   : > { %v1334_v47 = vpop.xlane.xlu1 %1333  ;;  %v1387_v62 = vadd.f32 %v1371_v61, %v1355_v60 }
 0x36f   : > { %v1354_v49 = vmul.f32 -0.5, %v1334_v47  ;;  %1441 = vperm.xlu1 %1877, %v1383_v46  }
 0x371   : > { %v1386_v52 = vadd.f32 %v1370_v45, %v1354_v49 }
 0x373   : > { %1456 = vperm.xlu0 %1878, %v1386_v52   ;;  %1431 = vperm.xlu1 %1877, %v1381_v54  }
 0x377   : > { %1466 = vperm.xlu0 %1878, %v1388_v58   ;;  %1451 = vperm.xlu1 %1877, %v1385_v59  }
 0x37b   : > { %1461 = vperm.xlu1 %1877, %v1387_v62  }
 0x3d2   : > { %v1402_v31 = vpop.permute.xlu1 %1401 }
 0x3d3   : > { %1471 = vst [vmem:[%s2483_s17 + $0x10] sm:$0xff] %v1402_v31  ;;  %v1392_v63 = vpop.permute.xlu0 %1391 }
 0x3d4   : > { %1469 = vst [vmem:[%s2483_s17] sm:$0xff] %v1392_v63 }
 0x3d6   : > { %v1407_v0 = vpop.permute.xlu1 %1406 }
 0x3d7   : > { %1472 = vst [vmem:[%s2483_s17 + $0x18] sm:$0xff] %v1407_v0 }
 0x3da   : > { %v1397_v1 = vpop.permute.xlu1 %1396 }
 0x3db   : > { %1470 = vst [vmem:[%s2483_s17 + $0x8] sm:$0xff] %v1397_v1 }
 0x3de   : > { %v1422_v2 = vpop.permute.xlu1 %1421 }
 0x3df   : > { %1475 = vst [vmem:[%s2483_s17 + $0x30] sm:$0xff] %v1422_v2 }
 0x3e2   : > { %v1412_v3 = vpop.permute.xlu1 %1411 }
 0x3e3   : > { %1473 = vst [vmem:[%s2483_s17 + $0x20] sm:$0xff] %v1412_v3 }
 0x3e6   : > { %v1447_v5 = vpop.permute.xlu0 %1446  ;;  %v1427_v6 = vpop.permute.xlu1 %1426 }
 0x3e7   : > { %1480 = vst [vmem:[%s2483_s17 + $0x58] sm:$0xff] %v1447_v5  ;;  %1476 = vst [vmem:[%s2483_s17 + $0x38] sm:$0xff] %v1427_v6 }
 0x3ea   : > { %v1437_v7 = vpop.permute.xlu0 %1436  ;;  %v1417_v8 = vpop.permute.xlu1 %1416 }
 0x3eb   : > { %1478 = vst [vmem:[%s2483_s17 + $0x48] sm:$0xff] %v1437_v7  ;;  %1474 = vst [vmem:[%s2483_s17 + $0x28] sm:$0xff] %v1417_v8 }
 0x3ee   : > { %v1442_v10 = vpop.permute.xlu1 %1441 }
 0x3ef   : > { %1479 = vst [vmem:[%s2483_s17 + $0x50] sm:$0xff] %v1442_v10 }
 0x3f2   : > { %v1457_v11 = vpop.permute.xlu0 %1456  ;;  %v1432_v13 = vpop.permute.xlu1 %1431 }
 0x3f3   : > { %1482 = vst [vmem:[%s2483_s17 + $0x68] sm:$0xff] %v1457_v11  ;;  %1477 = vst [vmem:[%s2483_s17 + $0x40] sm:$0xff] %v1432_v13 }
 0x3f6   : > { %v1467_v14 = vpop.permute.xlu0 %1466  ;;  %v1452_v15 = vpop.permute.xlu1 %1451 }
 0x3f7   : > { %1484 = vst [vmem:[%s2483_s17 + $0x78] sm:$0xff] %v1467_v14  ;;  %1481 = vst [vmem:[%s2483_s17 + $0x60] sm:$0xff] %v1452_v15 }
 0x3fa   : > { %v1462_v16 = vpop.permute.xlu1 %1461 }
 0x3fb   : > { %1483 = vst [vmem:[%s2483_s17 + $0x70] sm:$0xff] %v1462_v16 }
 0x3fc   : > { %2010 = shalt.err (!%p2007_p3)
}
 0x3fd   : > { %s2011_s28 = scalar_lea.hbm %s2505_s15, 2048  ;;  %s2015_s29 = scalar_lea.hbm %s2565_s12, 4096 }
 0x3fe   : > { %p2012_p4 = scmp.ne.s32.totalorder %s2505_s15, %s2011_s28  ;;  %p2016_p9 = scmp.lt.u32.totalorder %s2505_s15, %s2565_s12 }
 0x3ff   : > { %p2017_p10 = scmp.lt.u32.totalorder %s2015_s29, %s2011_s28  ;;  %p2019_p12 = scmp.lt.u32.totalorder %s2011_s28, %s2505_s15 }
 0x400   : > { %p2013_p7 = pnand %p2012_p4, %p2168_p5 }
 0x401   : > { %p2018_p11 = por %p2017_p10, %p2016_p9 }
 0x402   : > { %p2014_p8 = pneg %p2013_p7 }
 0x403   : > { %p2020_p13 = por %p2019_p12, %p2018_p11 }
 0x405   : > { %p2021_p0 = pnand %p2020_p13, %p2014_p8 }
 0x407   : > { %2024 = shalt.err (!%p2021_p0)
}
 0x408   : > { %s2063_s16 = smov 128   ;;  %s2064_s18 = smov 8  }
 0x409   : > { %1835 = dma.vmem_to_hbm [thread:$0]  (%p2168_p5), %s2507_s20, 2048, %s2505_s15, %s2512_s19, %s2063_s16, %s2063_s16, %s2064_s18  }
 0x40a PF: > { %p1841_p1 = scmp.ge.s32.totalorder %s2059_s24, 2  ;;  %s1531_s17 = sand.u32 1, %s2047_s21  }
 0x40b   : > { %s1532_s28 = scalar_lea.sflag [#allocation3], %s1531_s17 }
 0x40c   : > { %p1838_p2 = pnand %p1841_p1, %p2172_p6 }
 0x40e   : > { %2042 = dma.done.wait (!%p1838_p2), %s1532_s28, 2048  }
 0x40f   : > { %2044 = vsyncadd (!%p1838_p2), %s1532_s28, 4294965248  ;;  %p23_p3 = scmp.ge.s32.totalorder %s2155_s27, 4   ;;  %s2570_s21 = smov %s2051_s22 }
 0x410   : > { %s2571_s22 = smov %s2055_s23  ;;  %s2572_s23 = smov %s2166_s30 }
 0x411   : > { %s2573_s24 = smov %s2155_s27  ;;  %25 = sbr.rel (!%p23_p3) target bundleno = 5 (0x5), region = 117 }
 0x418   :  { %1537 = vsyncpa [#allocation3], 1 }
 0x419   :  { %1539 = vsyncpa [#allocation3 + $0x1], 1 }

</bundles_post_ra>
